<compile_context>
chip_gen: v7x
topology: tpu7x:2x2x1
jax: 0.10.0
libtpu: 0.0.40
codegen_flags: <defaults>
</compile_context>

<pallas_src>
import numpy as np
import jax
import jax.numpy as jnp
from jax.experimental import pallas as pl
from jax.experimental.pallas import tpu as pltpu


def _round_up(x, m):
    return (x + m - 1) // m * m


def _vmem_budget_bytes():
    """~75% of per-core VMEM (≈48 MiB on v7x, ≈96 MiB on v5e/v6e)."""
    cap = 64 << 20  # conservative default = v7x per-TC capacity
    try:
        info = pltpu.get_tpu_info()
        cap = int(getattr(info, "vmem_capacity_bytes", cap)) or cap
    except Exception:
        pass
    return max((cap * 3) // 4, 16 << 20)


def _make_gather_kernel(epilogue):
    def kernel(tv_ref, onehot_ref, out_ref):
        # (TB, P) x (P, TK) one-hot matmul == column gather: every output
        # element is an exact copy of one input element (one x*1 plus zeros).
        acc = jnp.dot(tv_ref[...], onehot_ref[...],
                      preferred_element_type=jnp.float32)
        # `function` fused into the epilogue -> no extra HBM round-trip for the
        # (B, K) input_tensor.
        out_ref[...] = epilogue(acc).astype(out_ref.dtype)
    return kernel


def formula_forward_pallas(truth_values, concat_indices, *, epilogue=None,
                           tile_b=1024, tile_k=None, force_pallas=False):
    """Formula.forward: concat of sub-formula (predicate-selector) outputs,
    with an elementwise `function` fused into the kernel epilogue.

    No wrapper-side padding/slicing: ragged batch / K tiles are handled by the
    Pallas grid (partial blocks are masked at the store).
    """
    if epilogue is None:
        epilogue = lambda x: x

    B, P = truth_values.shape

    # v7x MXU has no integer path: compute in the input float dtype (bf16 stays
    # bf16 -- exact for a one-hot gather) or upcast bools/ints to f32.
    if jnp.issubdtype(truth_values.dtype, jnp.floating):
        compute_dtype = truth_values.dtype
    else:
        compute_dtype = jnp.float32
    tv = truth_values if truth_values.dtype == compute_dtype \
        else truth_values.astype(compute_dtype)

    idx = np.asarray(concat_indices, dtype=np.int64).reshape(-1)
    K = int(idx.shape[0])
    if K == 0:
        return jnp.zeros((B, 0), dtype=compute_dtype)
    if idx.min() < 0 or idx.max() >= P:
        raise ValueError(
            f"predicate index out of range [0, {P}): "
            f"min={int(idx.min())}, max={int(idx.max())}")

    # Small-problem fast path: a static XLA gather beats kernel launch overhead.
    if not force_pallas and B * max(P, K) <= 16384:
        return epilogue(tv[:, jnp.asarray(idx, dtype=jnp.int32)])

    itemsize = jnp.dtype(compute_dtype).itemsize

    # Static one-hot gather matrix, built once on host (indices are static per
    # Formula instance). Shape (P, K) -- no padding, no extra device copies.
    one_hot = jnp.asarray(np.arange(P)[:, None] == idx[None, :],
                          dtype=compute_dtype)

    # ---- tile sizes --------------------------------------------------------
    TB = max(8, _round_up(min(tile_b, B), 8))
    if tile_k is None:
        # K fits one lane-dense tile when small; otherwise 256-aligned tiles
        # (full MXU width on v6e/v7x), capped at 512.
        TK = K if K <= 256 else min(512, _round_up(K, 256))
    else:
        TK = min(_round_up(tile_k, 128), _round_up(K, 128))

    # Shrink tiles until the double-buffered working set actually fits the VMEM
    # budget (instead of merely raising the limit and hoping).
    budget = _vmem_budget_bytes()

    def working_set(tb, tk):
        # double-buffered tv tile + one_hot tile + output tile
        return 2 * (tb * P + P * tk + tb * tk) * itemsize

    while working_set(TB, TK) > budget:
        if TB > 8 and (TB >= TK or TK <= 128):
            TB = max(8, _round_up(TB // 2, 8))
        elif TK > 128:
            TK = max(128, _round_up(TK // 2, 128))
        else:
            break

    # K tiles innermost: the tv block index is constant across the inner loop,
    # so truth_values are streamed from HBM exactly once.
    grid = (pl.cdiv(B, TB), pl.cdiv(K, TK))

    out = pl.pallas_call(
        _make_gather_kernel(epilogue),
        out_shape=jax.ShapeDtypeStruct((B, K), compute_dtype),
        grid_spec=pltpu.PrefetchScalarGridSpec(
            num_scalar_prefetch=0,
            grid=grid,
            in_specs=[
                pl.BlockSpec((TB, P), lambda i, j: (i, 0)),   # truth values
                pl.BlockSpec((P, TK), lambda i, j: (0, j)),   # one-hot gather
            ],
            out_specs=pl.BlockSpec((TB, TK), lambda i, j: (i, j)),
        ),
        compiler_params=pltpu.CompilerParams(
            dimension_semantics=("parallel", "parallel"),
            vmem_limit_bytes=int(budget),
        ),
    )(tv, one_hot)

    return out


class PredicateSelector:
    """Minimal concrete sub-formula: selects a fixed set of predicate columns."""

    def __init__(self, predicate_indices):
        self.predicates = list(predicate_indices)

    def forward(self, truth_values):  # pure-JAX reference path
        return truth_values[:, jnp.asarray(self.predicates, dtype=jnp.int32)]


class FormulaPallas:
    """JAX/Pallas port of Formula (forward pass only)."""

    def __init__(self, sub_formulas):
        if sub_formulas is not None:
            self.sub_formulas = sub_formulas
            # deterministic de-dup (torch used set() -> nondeterministic order)
            self.predicates = list(dict.fromkeys(
                p for sf in sub_formulas for p in sf.predicates))
        self.input_tensor = None
        # concat order == sub-formula order, matching torch.concat(inputs, 1)
        self._concat_indices = np.asarray(
            [p for sf in sub_formulas for p in sf.predicates], dtype=np.int64)

    def function(self, truth_values):
        # TODO(synk): abstract (`pass`) in the torch base class; identity here.
        # Concrete elementwise subclasses are fused into the kernel epilogue.
        return truth_values

    def forward(self, truth_values, **pallas_kwargs):
        out = formula_forward_pallas(
            truth_values, self._concat_indices,
            epilogue=self.function, **pallas_kwargs)
        # TODO(synk): with a fused non-identity `function`, the pre-function
        # concat (torch's input_tensor, only needed by backward()) is not
        # materialized separately; this is a forward-only port.
        self.input_tensor = out
        return out


if __name__ == "__main__":
    key = jax.random.PRNGKey(0)
    k1, k2 = jax.random.split(key)

    # --- Test 1: tiny shapes typical of the module ---------------------------
    B1, P1 = 8, 16
    tv1 = jax.random.uniform(k1, (B1, P1), dtype=jnp.float32)
    subs1 = [PredicateSelector([0, 3, 7]),
             PredicateSelector([1, 4]),
             PredicateSelector([2, 5, 9, 11])]
    f1 = FormulaPallas(subs1)
    ref1 = jnp.concatenate([sf.forward(tv1) for sf in subs1], axis=1)

    out1 = jax.block_until_ready(f1.forward(tv1))          # fast path (tiny)
    assert out1.shape == ref1.shape, (out1.shape, ref1.shape)
    assert jnp.allclose(out1, ref1, atol=1e-6)

    out1p = jax.block_until_ready(                          # forced Pallas path
        formula_forward_pallas(tv1, f1._concat_indices, force_pallas=True))
    assert jnp.allclose(out1p, ref1, atol=1e-6)

    # --- Test 2: ragged batch + multiple K tiles through the Pallas kernel ---
    B2, P2 = 300, 40
    tv2 = jax.random.uniform(k2, (B2, P2), dtype=jnp.float32)
    subs2 = [PredicateSelector(list(range(0, P2, 2))),        # 20 cols
             PredicateSelector(list(range(1, P2, 3))),        # 13 cols
             PredicateSelector([5] * 60),                     # 60 repeated cols
             PredicateSelector(list(reversed(range(P2))))]    # 40 cols -> K=133
    f2 = FormulaPallas(subs2)
    out2 = jax.block_until_ready(f2.forward(tv2, tile_b=128, tile_k=128))
    ref2 = jnp.concatenate([sf.forward(tv2) for sf in subs2], axis=1)
    assert out2.shape == ref2.shape, (out2.shape, ref2.shape)
    assert jnp.allclose(out2, ref2, atol=1e-6)

    # --- Test 3: concrete elementwise `function` fused into the epilogue -----
    class NotFormula(FormulaPallas):
        def function(self, x):
            return 1.0 - x                                   # fuzzy NOT

    f3 = NotFormula(subs1)
    out3 = jax.block_until_ready(f3.forward(tv1, force_pallas=True))
    assert jnp.allclose(out3, 1.0 - ref1, atol=1e-6)

    print("KERNEL_OK")
</pallas_src>

<mosaic_0001>
module attributes {stable_mosaic.version = 11 : i64} {
  func.func @kernel(%arg0: i32, %arg1: i32, %arg2: memref<8x16xf32, #tpu.memory_space<vmem>>, %arg3: memref<16x9xf32, #tpu.memory_space<vmem>>, %arg4: memref<8x9xf32, #tpu.memory_space<vmem>>) attributes {dimension_semantics = [#tpu.dimension_semantics<parallel>, #tpu.dimension_semantics<parallel>], iteration_bounds = array<i64: 1, 1>, scalar_prefetch = 0 : i64, scratch_operands = 0 : i64, tpu.core_type = #tpu.core_type<tc>, window_params = [{transform_indices = @transform_0, window_bounds = array<i64: 8, 16>}, {transform_indices = @transform_1, window_bounds = array<i64: 16, 9>}, {transform_indices = @transform_2, window_bounds = array<i64: 8, 9>}]} {
    %c0 = arith.constant 0 : index
    %c0_0 = arith.constant 0 : index
    %0 = vector.load %arg2[%c0, %c0_0] : memref<8x16xf32, #tpu.memory_space<vmem>>, vector<8x16xf32>
    %c0_1 = arith.constant 0 : index
    %c0_2 = arith.constant 0 : index
    %1 = vector.load %arg3[%c0_1, %c0_2] : memref<16x9xf32, #tpu.memory_space<vmem>>, vector<16x9xf32>
    %cst = arith.constant dense<0.000000e+00> : vector<8x9xf32>
    %2 = tpu.matmul %0, %1, %cst {dimension_numbers = #tpu.dot_dimension_numbers<[1], [0], [0], [1], [0, 0, 1, 1], [], []>} : vector<8x16xf32>, vector<16x9xf32>, vector<8x9xf32> -> vector<8x9xf32>
    %c0_3 = arith.constant 0 : index
    %c0_4 = arith.constant 0 : index
    %3 = vector.load %arg4[%c0_3, %c0_4] : memref<8x9xf32, #tpu.memory_space<vmem>>, vector<8x9xf32>
    tpu.vector_store %arg4[%c0_3, %c0_4], %2 {strides = array<i32>} : memref<8x9xf32, #tpu.memory_space<vmem>>, vector<8x9xf32>,
    return
  }
  func.func @transform_0(%arg0: i32, %arg1: i32) -> (i32, i32) {
    %c0_i32 = arith.constant 0 : i32
    %c0_i32_0 = arith.constant 0 : i32
    return %arg0, %c0_i32 : i32, i32
  }
  func.func @transform_1(%arg0: i32, %arg1: i32) -> (i32, i32) {
    %c0_i32 = arith.constant 0 : i32
    %c0_i32_0 = arith.constant 0 : i32
    return %c0_i32, %arg1 : i32, i32
  }
  func.func @transform_2(%arg0: i32, %arg1: i32) -> (i32, i32) {
    %c0_i32 = arith.constant 0 : i32
    return %arg0, %arg1 : i32, i32
  }
}

</mosaic_0001>

<bundles_post_ra>
// kernel: tpu_custom_call.1
= control target key start
LH: loop header
LB: loop body
LE: loop exit
PB: predicated region body
PF: predicated region fallthrough
CT: control target
= control target key end

     0   :  { %7 = vsyncpa [#allocation3], 0  ;;  %s293_s0 = inlined_call_operand.hbm [shape: f32[8,16], index: 0, kind: input, shape index: {}]   ;;  %s294_s1 = inlined_call_operand.hbm [shape: f32[16,9], index: 1, kind: input, shape index: {}]   ;;  %s295_s2 = inlined_call_operand.hbm [shape: f32[8,9], index: 2, kind: output, shape index: {}]  }
   0x1   :  { %8 = vsyncpa [#allocation6], 0 }
   0x2   :  { %9 = vsyncpa [#allocation4], 0  ;;  %s227_s9 = smov [#allocation2]   ;;  %s228_s11 = smov [#allocation5]  }
   0x3   :  { %s16_s10 = sshll.u32 %s227_s9, 4  ;;  %s25_s12 = sshll.u32 %s228_s11, 4  ;;  %s17_s10 = int_to_ptr.vmem [resolvable:$true] %s16_s10  ;;  %s250_s12 = int_to_ptr.vmem [resolvable:$true] %s25_s12 }
   0x4   :  { %s155_s15 = scalar_lea.hbm %s293_s0, 128 }
   0x5   :  { %p156_p0 = scmp.ne.s32.totalorder %s293_s0, %s155_s15  ;;  %p159_p1 = scmp.lt.u32.totalorder %s155_s15, %s293_s0 }
   0x7   :  { %p161_p2 = pnand %p159_p1, %p156_p0 }
   0x9   :  { %164 = shalt.err (!%p161_p2)
}
   0xa   :  { %s165_s20 = scalar_lea.vmem %s17_s10, 128  ;;  %p170_p4 = scmp.lt.s32.totalorder %s17_s10, %s17_s10 }
   0xb   :  { %p166_p3 = scmp.ne.s32.totalorder %s17_s10, %s165_s20  ;;  %p171_p5 = scmp.lt.s32.totalorder %s165_s20, %s165_s20 }
   0xd   :  { %p172_p6 = por %p171_p5, %p170_p4 }
   0xf   :  { %p173_p7 = pnand %p172_p6, %p166_p3 }
  0x11   :  { %176 = shalt.err (!%p173_p7)
}
  0x12   :  { %19 = dma.hbm_to_vmem [thread:$0]  %s293_s0, 128, %s17_s10, [#allocation3]  }
  0x13   :  { %s177_s25 = scalar_lea.hbm %s294_s1, 256 }
  0x14   :  { %p178_p8 = scmp.ne.s32.totalorder %s294_s1, %s177_s25  ;;  %p181_p9 = scmp.lt.u32.totalorder %s177_s25, %s294_s1 }
  0x16   :  { %p183_p10 = pnand %p181_p9, %p178_p8 }
  0x18   :  { %186 = shalt.err (!%p183_p10)
}
  0x19   :  { %s187_s30 = scalar_lea.vmem %s250_s12, 256  ;;  %p192_p12 = scmp.lt.s32.totalorder %s250_s12, %s250_s12 }
  0x1a   :  { %p188_p11 = scmp.ne.s32.totalorder %s250_s12, %s187_s30  ;;  %p193_p13 = scmp.lt.s32.totalorder %s187_s30, %s187_s30 }
  0x1c   :  { %p194_p0 = por %p193_p13, %p192_p12 }
  0x1e   :  { %p195_p1 = pnand %p194_p0, %p188_p11 }
  0x20   :  { %198 = shalt.err (!%p195_p1)
}
  0x21   :  { %s229_s0 = smov 128   ;;  %s230_s3 = smov 8  }
  0x22   :  { %31 = dma.hbm_to_vmem [thread:$0]  %s294_s1, 256, %s250_s12, [#allocation6], %s229_s0, %s229_s0, %s230_s3  }
  0x23   :  { %221 = dma.done.wait [#allocation3], 128  }
  0x24   :  { %222 = vsyncadd [#allocation3], 4294967168 }
  0x25   :  { %223 = dma.done.wait [#allocation6], 256  }
  0x26   :  { %224 = vsyncadd [#allocation6], 4294967040  ;;  %v231_v0 = vmov 0.0|0.0   ;;  %vm232_vm0 = vmmov 0   ;;  %v233_v1 = vmov 0.0   ;;  %v39_v2 = vld [vmem:[#allocation5] sm:$0xff] }
  0x27   :  { %144 = vmatprep.subr.bf16.mxu0 %v231_v0  ;;  %141 = vmatprep.mubr.msk.f32.mxu0 %vm232_vm0, %v233_v1  ;;  %v40_v3 = vld [vmem:[#allocation5 + $0x8] sm:$0xff]  ;;  %v38_v5 = vld [vmem:[#allocation2] sm:$0xff]  ;;  %vm41_vm1 = vcmask 130048   ;;  %s234_s6 = smov [#allocation7]   ;;  %vm115_vm2 = vcmask 72704  }
  0x28   :  { %v145_v4 = vpack.c.bf16 %v40_v3, %v39_v2  ;;  %s123_s7 = sshll.u32 %s234_s6, 4  ;;  %s124_s7 = int_to_ptr.vmem [resolvable:$true] %s123_s7 }
  0x29   :  { %s199_s1 = scalar_lea.vmem %s124_s7, 128  ;;  %p204_p3 = scmp.lt.s32.totalorder %s124_s7, %s124_s7 }
  0x2a   :  { %146 = vmatpush3.bf16.msra.mxu0 %v145_v4  ;;  %p200_p2 = scmp.ne.s32.totalorder %s124_s7, %s199_s1  ;;  %p205_p4 = scmp.lt.s32.totalorder %s199_s1, %s199_s1 }
  0x2c   :  { %p206_p5 = por %p205_p4, %p204_p3 }
  0x2d   :  { %142 = vmatmul.mubr.msk.f32.vlgmr.msra.gmra.mrb[0].mxu0 %vm41_vm1, %v38_v5 }
  0x2e   :  { %p207_p6 = pnand %p206_p5, %p200_p2 }
 0x100   :  { %v111_v6 = vpop.f32.mrb[0].mxu0 }
 0x101   :  { %v143_v7 = vpop.f32.mrb[1].mxu0  ;;  %116 = vst.msk [vmem:[#allocation7] sm:$0xff] %vm115_vm2, %v111_v6 }
 0x102   :  { %210 = shalt.err (!%p207_p6)
}
 0x103   :  { %s211_s10 = scalar_lea.hbm %s295_s2, 128 }
 0x104   :  { %p212_p7 = scmp.ne.s32.totalorder %s295_s2, %s211_s10  ;;  %p215_p8 = scmp.lt.u32.totalorder %s211_s10, %s295_s2 }
 0x106   :  { %p217_p9 = pnand %p215_p8, %p212_p7 }
 0x108   :  { %220 = shalt.err (!%p217_p9)
}
 0x109   :  { %126 = dma.vmem_to_hbm [thread:$0]  %s124_s7, 128, %s295_s2, [#allocation4]  }
 0x10a   :  { %225 = dma.done.wait [#allocation4], 128  }
 0x10b   :  { %226 = vsyncadd [#allocation4], 4294967168 }
 0x10c   :  { %130 = vsyncpa [#allocation3], 1 }
 0x10d   :  { %131 = vsyncpa [#allocation6], 1 }
 0x10e   :  { %132 = vsyncpa [#allocation4], 1 }

</bundles_post_ra>
